<compile_context>
chip_gen: v6e
topology: v6e:2x2x1
jax: 0.10.0
libtpu: 0.0.40
codegen_flags: <defaults>
</compile_context>

<pallas_src>
import jax
import jax.numpy as jnp
from jax.experimental import pallas as pl
from jax.experimental.pallas import tpu as pltpu

# ----- model dimensions (from the module's __init__) -----
CPG_PARAM_SIZE = 16     # params['cpg_param_size']
INPUT_SIZE     = 32     # params['input_size_low_level_control']
HIDDEN         = 64
LANES          = 128
WIDE           = 2 * LANES   # 256-lane-wide fused stage-2 weight region

# ----- packed parameter slab layout: rows of a (312, 256) f32 array -----
_R_W1A  = 0             # rows   0: 16, lanes   0:128 : ew1 -> enc hidden (lanes 0:64)
_R_W1B  = 16            # rows  16: 48, lanes   0:128 : tw1 -> trans hidden (lanes 64:128)
_R_W2   = 48            # rows  48:176, lanes   0:256 : [ W2 (z|z_) | W23 = ew2@dw1 ]
_R_W4   = 176           # rows 176:304, lanes   0:128 : dw2 -> y lanes 64:80
_R_MISC = 304           # rows 304:312 : bias / alpha rows (see pack_params)
_R_TOTAL = 312

# output slab lane layout: [ z (0:32) | z_ (32:64) | y (64:80) | zeros (80:128) ]
_Z_LO, _Z_HI   = 0, INPUT_SIZE
_ZP_LO, _ZP_HI = INPUT_SIZE, 2 * INPUT_SIZE
_Y_LO, _Y_HI   = 2 * INPUT_SIZE, 2 * INPUT_SIZE + CPG_PARAM_SIZE


def controller_v5_kernel(x_ref, xp_ref, p_ref, o_ref):
    """x_ref: (TB,16) cpg params; xp_ref: (TB,32); p_ref: (312,256) packed
    weights (VMEM-resident, constant index_map); o_ref: (TB,128) = [z|z_|y|0].

    Zero-lane invariants the slab layout must keep (else y/z lanes get
    polluted silently):
      * W1B lanes 0:64 and W1A lanes 64:128 are zero (block-diagonal stage 1),
      * stage-2 region lanes 64:128 and 192:256 are zero, as are the matching
        lanes of the b2/b3 bias row  ->  s2 lanes 64:128 == 0 and
        h3 lanes 64:128 == 0 exactly (so the broadcast decoder alpha is inert),
      * W4 rows 64:128 are zero and b4 lanes 0:64 / 80:128 are zero
        ->  s4 lanes outside 64:80 == 0, so o = s2 + s4 assembles cleanly.
    """
    x  = x_ref[...]                                   # (TB, 16)
    xp = xp_ref[...]                                  # (TB, 32)

    misc = p_ref[_R_MISC:_R_MISC + 8, :]              # (8, 256), one small load
    b1  = misc[0:1, 0:LANES]                          # [eb1 | tb1]
    a1  = misc[1:2, 0:LANES]                          # [ea  | ta ] per-lane PReLU alpha
    b23 = misc[2:3, :]                                # [eb2 | tb2 | 0 | b3_eff | 0]
    a3  = misc[3:4, 0:LANES]                          # decoder PReLU alpha (broadcast)
    b4  = misc[4:5, 0:LANES]                          # [0 | 0 | db2 | 0]

    # stage 1: encoder-L1 and transform-L1 as two independent small-K dots
    # summed into one (TB,128) hidden slab  [enc_hidden | trans_hidden].
    h1 = (jnp.dot(x,  p_ref[_R_W1A:_R_W1A + CPG_PARAM_SIZE, 0:LANES],
                  preferred_element_type=jnp.float32)
          + jnp.dot(xp, p_ref[_R_W1B:_R_W1B + INPUT_SIZE, 0:LANES],
                    preferred_element_type=jnp.float32)
          + b1)
    h1 = jnp.where(h1 > 0, h1, a1 * h1)

    # stage 2: ONE 256-lane-wide dot (full MXU width on v6e/v7x) producing
    #   lanes   0:128 -> s2     = [ z | z_ | 0 ]
    #   lanes 128:256 -> h3_pre = decoder-L1 pre-activation (folded W23), |0
    s23 = jnp.dot(h1, p_ref[_R_W2:_R_W2 + LANES, :],
                  preferred_element_type=jnp.float32) + b23
    s2 = s23[:, 0:LANES]
    h3 = s23[:, LANES:WIDE]
    h3 = jnp.where(h3 > 0, h3, a3 * h3)   # lanes 64:128 are exactly 0 -> PReLU inert there

    # stage 3: decoder-L2, routed into lanes 64:80 -> s4 = [0 | 0 | y | 0]
    s4 = jnp.dot(h3, p_ref[_R_W4:_R_W4 + LANES, 0:LANES],
                 preferred_element_type=jnp.float32) + b4

    # single lane-dense, unmasked output store: [z | z_ | y | 0]
    o_ref[...] = (s2 + s4).astype(o_ref.dtype)


def pack_params(params):
    """Pack all 15 parameter tensors into one (312, 256) f32 slab (call ONCE).

    Also folds decoder layer-1 into the weights:  W23 = ew2 @ dw1,
    b3_eff = eb2 @ dw1 + db1, so the kernel needs only 3 dependent matmuls.
    """
    (ew1, eb1, ea, ew2, eb2,
     dw1, db1, da, dw2, db2,
     tw1, tb1, ta, tw2, tb2) = params
    C, I, H, L = CPG_PARAM_SIZE, INPUT_SIZE, HIDDEN, LANES

    slab = jnp.zeros((_R_TOTAL, WIDE), jnp.float32)

    # stage-1 weights (block-diagonal over the output lanes)
    slab = slab.at[_R_W1A:_R_W1A + C, 0:H].set(ew1)          # x  -> enc hidden (lanes 0:64)
    slab = slab.at[_R_W1B:_R_W1B + I, H:2 * H].set(tw1)      # x_ -> trans hidden (lanes 64:128)

    # stage-2 fused region: [ W2 | W23 ]
    slab = slab.at[_R_W2 + 0:_R_W2 + H, 0:I].set(ew2)            # enc hid -> z  (lanes 0:32)
    slab = slab.at[_R_W2 + H:_R_W2 + 2 * H, I:2 * I].set(tw2)    # trn hid -> z_ (lanes 32:64)
    w23 = ew2 @ dw1                                               # (64, 64) decoder-L1 fold
    slab = slab.at[_R_W2 + 0:_R_W2 + H, L:L + H].set(w23)        # enc hid -> dec hidden (lanes 128:192)

    # stage-3 weights: decoder-L2, writes y into lanes 64:80
    slab = slab.at[_R_W4 + 0:_R_W4 + H, _Y_LO:_Y_HI].set(dw2)

    # bias / alpha rows
    b3_eff = eb2 @ dw1 + db1                                      # (1, 64)
    slab = slab.at[_R_MISC + 0:_R_MISC + 1, 0:H].set(eb1)
    slab = slab.at[_R_MISC + 0:_R_MISC + 1, H:2 * H].set(tb1)
    slab = slab.at[_R_MISC + 1:_R_MISC + 2, 0:H].set(ea[0, 0])
    slab = slab.at[_R_MISC + 1:_R_MISC + 2, H:2 * H].set(ta[0, 0])
    slab = slab.at[_R_MISC + 2:_R_MISC + 3, 0:I].set(eb2)
    slab = slab.at[_R_MISC + 2:_R_MISC + 3, I:2 * I].set(tb2)
    slab = slab.at[_R_MISC + 2:_R_MISC + 3, L:L + H].set(b3_eff)
    slab = slab.at[_R_MISC + 3:_R_MISC + 4, 0:L].set(da[0, 0])   # inert on zero lanes 64:128
    slab = slab.at[_R_MISC + 4:_R_MISC + 5, _Y_LO:_Y_HI].set(db2)
    return slab
    # TODO(synk): optionally store the slab (and activations) as bfloat16 to
    # halve the one-time weight DMA; keep preferred_element_type=f32 in the dots.


def _round_up(n, m):
    return ((n + m - 1) // m) * m


def controller_v5(x, x_, pslab, *, block_b=128):
    """Forward pass: returns (y, z, z_) matching ControllerV5.forward.

    Batched over rows with a 1-D grid; the weight slab's constant index_map
    keeps it VMEM-resident (fetched once), only activations/outputs stream.
    """
    B = x.shape[0]
    TB = min(block_b, _round_up(B, 8))        # rows per grid step (multiple of 8)
    Bp = _round_up(B, TB)
    if Bp != B:                               # pad ragged batches with zero rows
        x  = jnp.concatenate([x,  jnp.zeros((Bp - B, CPG_PARAM_SIZE), x.dtype)], axis=0)
        x_ = jnp.concatenate([x_, jnp.zeros((Bp - B, INPUT_SIZE), x_.dtype)], axis=0)

    grid = (pl.cdiv(Bp, TB),)
    out = pl.pallas_call(
        controller_v5_kernel,
        out_shape=jax.ShapeDtypeStruct((Bp, LANES), jnp.float32),
        grid=grid,
        in_specs=[
            pl.BlockSpec((TB, CPG_PARAM_SIZE), lambda i: (i, 0)),   # x rows stream
            pl.BlockSpec((TB, INPUT_SIZE),     lambda i: (i, 0)),   # x_ rows stream
            pl.BlockSpec((_R_TOTAL, WIDE),     lambda i: (0, 0)),   # weights: resident
        ],
        out_specs=pl.BlockSpec((TB, LANES), lambda i: (i, 0)),
        compiler_params=pltpu.CompilerParams(
            dimension_semantics=("parallel",)),    # 2-TC sharding on v7x; no-op otherwise
        cost_estimate=pl.CostEstimate(
            flops=2 * Bp * (CPG_PARAM_SIZE * LANES + INPUT_SIZE * LANES
                            + LANES * WIDE + LANES * LANES),
            transcendentals=0,
            bytes_accessed=4 * (Bp * (CPG_PARAM_SIZE + INPUT_SIZE + LANES)
                                + _R_TOTAL * WIDE),
        ),
    )(x, x_, pslab)

    z  = out[:B, _Z_LO:_Z_HI]
    zt = out[:B, _ZP_LO:_ZP_HI]
    y  = out[:B, _Y_LO:_Y_HI]
    return y, z, zt
    # TODO(synk): for the single-step latency mode, prefetch the weight slab to
    # VMEM in a prior pallas_call and hand over (DMA semaphore, VMEM ref)
    # outputs instead of re-passing pslab from HBM every call.


# ----- deterministic parameter initialization (PyTorch Linear-style bounds) -----
def _init_linear(key, fan_in, fan_out):
    kw, kb = jax.random.split(key)
    bound = 1.0 / jnp.sqrt(fan_in)
    # stored as (in, out): equivalent to torch's (out, in) weight, transposed
    w = jax.random.uniform(kw, (fan_in, fan_out), jnp.float32, -bound, bound)
    b = jax.random.uniform(kb, (1, fan_out), jnp.float32, -bound, bound)
    return w, b


def init_params(key):
    keys = jax.random.split(key, 6)
    # encoder: Linear(cpg, 64) -> PReLU -> Linear(64, input_size)
    ew1, eb1 = _init_linear(keys[0], CPG_PARAM_SIZE, HIDDEN)
    ew2, eb2 = _init_linear(keys[1], HIDDEN, INPUT_SIZE)
    ea = jnp.full((1, 1), 0.25, jnp.float32)
    # decoder: Linear(input_size, 64) -> PReLU -> Linear(64, cpg)
    dw1, db1 = _init_linear(keys[2], INPUT_SIZE, HIDDEN)
    dw2, db2 = _init_linear(keys[3], HIDDEN, CPG_PARAM_SIZE)
    da = jnp.full((1, 1), 0.25, jnp.float32)
    # transform: Linear(input_size, 64) -> PReLU -> Linear(64, input_size)
    tw1, tb1 = _init_linear(keys[4], INPUT_SIZE, HIDDEN)
    tw2, tb2 = _init_linear(keys[5], HIDDEN, INPUT_SIZE)
    ta = jnp.full((1, 1), 0.25, jnp.float32)
    return (ew1, eb1, ea, ew2, eb2,
            dw1, db1, da, dw2, db2,
            tw1, tb1, ta, tw2, tb2)


# pure-JAX reference for a sanity check (unfolded, matches the torch module)
def _reference(x, x_, params):
    (ew1, eb1, ea, ew2, eb2,
     dw1, db1, da, dw2, db2,
     tw1, tb1, ta, tw2, tb2) = params

    def mlp(v, w1, b1, a, w2, b2):
        h = v @ w1 + b1
        h = jnp.where(h > 0, h, a[0, 0] * h)
        return h @ w2 + b2

    z_ = mlp(x_, tw1, tb1, ta, tw2, tb2)
    z = mlp(x, ew1, eb1, ea, ew2, eb2)
    y = mlp(z, dw1, db1, da, dw2, db2)
    return y, z, z_


if __name__ == "__main__":
    key = jax.random.PRNGKey(0)
    k_params = jax.random.fold_in(key, 1)

    params = init_params(k_params)
    pslab = pack_params(params)          # pack + fold W2@W3 ONCE, outside the hot path

    fwd = jax.jit(controller_v5)

    # B=256 exercises the 2-step batched grid (TB=128); B=100 exercises the
    # ragged-batch padding path (TB=104, grid=1).
    for B in (256, 100):
        kx  = jax.random.fold_in(key, 2 * B)
        kxp = jax.random.fold_in(key, 2 * B + 1)
        x  = jax.random.normal(kx,  (B, CPG_PARAM_SIZE), jnp.float32)   # encoder input
        x_ = jax.random.normal(kxp, (B, INPUT_SIZE), jnp.float32)       # transform input

        y, z, zt = jax.block_until_ready(fwd(x, x_, pslab))

        y_ref, z_ref, zt_ref = _reference(x, x_, params)
        # default MXU dot precision (bf16 passes) + the W2@W3 fold -> ~1e-4-1e-3 error
        assert jnp.allclose(y, y_ref, atol=1e-3, rtol=1e-3), f"y mismatch (B={B})"
        assert jnp.allclose(z, z_ref, atol=1e-3, rtol=1e-3), f"z mismatch (B={B})"
        assert jnp.allclose(zt, zt_ref, atol=1e-3, rtol=1e-3), f"z_ mismatch (B={B})"

    print("KERNEL_OK")
</pallas_src>

<mosaic_0001>
module attributes {stable_mosaic.version = 11 : i64} {
  func.func @controller_v5_kernel(%arg0: i32, %arg1: memref<128x16xf32, #tpu.memory_space<vmem>>, %arg2: memref<128x32xf32, #tpu.memory_space<vmem>>, %arg3: memref<312x256xf32, #tpu.memory_space<vmem>>, %arg4: memref<128x128xf32, #tpu.memory_space<vmem>>) attributes {dimension_semantics = [#tpu.dimension_semantics<parallel>], iteration_bounds = array<i64: 2>, scalar_prefetch = 0 : i64, scratch_operands = 0 : i64, tpu.core_type = #tpu.core_type<tc>, window_params = [{transform_indices = @transform_0, window_bounds = array<i64: 128, 16>}, {transform_indices = @transform_1, window_bounds = array<i64: 128, 32>}, {pipeline_mode = #tpu.pipeline_mode<synchronous>, transform_indices = @transform_2, window_bounds = array<i64: 312, 256>}, {transform_indices = @transform_3, window_bounds = array<i64: 128, 128>}]} {
    %c0 = arith.constant 0 : index
    %c0_0 = arith.constant 0 : index
    %0 = vector.load %arg1[%c0, %c0_0] : memref<128x16xf32, #tpu.memory_space<vmem>>, vector<128x16xf32>
    %c0_1 = arith.constant 0 : index
    %c0_2 = arith.constant 0 : index
    %1 = vector.load %arg2[%c0_1, %c0_2] : memref<128x32xf32, #tpu.memory_space<vmem>>, vector<128x32xf32>
    %c304 = arith.constant 304 : index
    %c0_3 = arith.constant 0 : index
    %2 = vector.load %arg3[%c304, %c0_3] : memref<312x256xf32, #tpu.memory_space<vmem>>, vector<8x256xf32>
    %3 = vector.extract_strided_slice %2 {offsets = [0, 0], sizes = [1, 128], strides = [1, 1]} : vector<8x256xf32> to vector<1x128xf32>
    %4 = vector.extract_strided_slice %2 {offsets = [1, 0], sizes = [1, 128], strides = [1, 1]} : vector<8x256xf32> to vector<1x128xf32>
    %5 = vector.extract_strided_slice %2 {offsets = [2, 0], sizes = [1, 256], strides = [1, 1]} : vector<8x256xf32> to vector<1x256xf32>
    %6 = vector.extract_strided_slice %2 {offsets = [3, 0], sizes = [1, 128], strides = [1, 1]} : vector<8x256xf32> to vector<1x128xf32>
    %7 = vector.extract_strided_slice %2 {offsets = [4, 0], sizes = [1, 128], strides = [1, 1]} : vector<8x256xf32> to vector<1x128xf32>
    %c0_4 = arith.constant 0 : index
    %c0_5 = arith.constant 0 : index
    %8 = vector.load %arg3[%c0_4, %c0_5] : memref<312x256xf32, #tpu.memory_space<vmem>>, vector<16x128xf32>
    %cst = arith.constant dense<0.000000e+00> : vector<128x128xf32>
    %9 = tpu.matmul %0, %8, %cst {dimension_numbers = #tpu.dot_dimension_numbers<[1], [0], [0], [1], [0, 0, 1, 1], [], []>} : vector<128x16xf32>, vector<16x128xf32>, vector<128x128xf32> -> vector<128x128xf32>
    %c16 = arith.constant 16 : index
    %c0_6 = arith.constant 0 : index
    %10 = vector.load %arg3[%c16, %c0_6] : memref<312x256xf32, #tpu.memory_space<vmem>>, vector<32x128xf32>
    %cst_7 = arith.constant dense<0.000000e+00> : vector<128x128xf32>
    %11 = tpu.matmul %1, %10, %cst_7 {dimension_numbers = #tpu.dot_dimension_numbers<[1], [0], [0], [1], [0, 0, 1, 1], [], []>} : vector<128x32xf32>, vector<32x128xf32>, vector<128x128xf32> -> vector<128x128xf32>
    %12 = arith.addf %9, %11 : vector<128x128xf32>
    %13 = vector.broadcast %3 : vector<1x128xf32> to vector<128x128xf32>
    %14 = arith.addf %12, %13 : vector<128x128xf32>
    %cst_8 = arith.constant 0.000000e+00 : f32
    %15 = vector.broadcast %cst_8 : f32 to vector<128x128xf32>
    %16 = arith.cmpf ogt, %14, %15 : vector<128x128xf32>
    %17 = vector.broadcast %4 : vector<1x128xf32> to vector<128x128xf32>
    %18 = arith.mulf %17, %14 : vector<128x128xf32>
    %19 = arith.select %16, %14, %18 : vector<128x128xi1>, vector<128x128xf32>
    %c48 = arith.constant 48 : index
    %c0_9 = arith.constant 0 : index
    %20 = vector.load %arg3[%c48, %c0_9] : memref<312x256xf32, #tpu.memory_space<vmem>>, vector<128x256xf32>
    %cst_10 = arith.constant dense<0.000000e+00> : vector<128x256xf32>
    %21 = tpu.matmul %19, %20, %cst_10 {dimension_numbers = #tpu.dot_dimension_numbers<[1], [0], [0], [1], [0, 0, 1, 1], [], []>} : vector<128x128xf32>, vector<128x256xf32>, vector<128x256xf32> -> vector<128x256xf32>
    %22 = vector.broadcast %5 : vector<1x256xf32> to vector<128x256xf32>
    %23 = arith.addf %21, %22 : vector<128x256xf32>
    %24 = vector.extract_strided_slice %23 {offsets = [0, 0], sizes = [128, 128], strides = [1, 1]} : vector<128x256xf32> to vector<128x128xf32>
    %25 = vector.extract_strided_slice %23 {offsets = [0, 128], sizes = [128, 128], strides = [1, 1]} : vector<128x256xf32> to vector<128x128xf32>
    %cst_11 = arith.constant 0.000000e+00 : f32
    %26 = vector.broadcast %cst_11 : f32 to vector<128x128xf32>
    %27 = arith.cmpf ogt, %25, %26 : vector<128x128xf32>
    %28 = vector.broadcast %6 : vector<1x128xf32> to vector<128x128xf32>
    %29 = arith.mulf %28, %25 : vector<128x128xf32>
    %30 = arith.select %27, %25, %29 : vector<128x128xi1>, vector<128x128xf32>
    %c176 = arith.constant 176 : index
    %c0_12 = arith.constant 0 : index
    %31 = vector.load %arg3[%c176, %c0_12] : memref<312x256xf32, #tpu.memory_space<vmem>>, vector<128x128xf32>
    %cst_13 = arith.constant dense<0.000000e+00> : vector<128x128xf32>
    %32 = tpu.matmul %30, %31, %cst_13 {dimension_numbers = #tpu.dot_dimension_numbers<[1], [0], [0], [1], [0, 0, 1, 1], [], []>} : vector<128x128xf32>, vector<128x128xf32>, vector<128x128xf32> -> vector<128x128xf32>
    %33 = vector.broadcast %7 : vector<1x128xf32> to vector<128x128xf32>
    %34 = arith.addf %32, %33 : vector<128x128xf32>
    %35 = arith.addf %24, %34 : vector<128x128xf32>
    %c0_14 = arith.constant 0 : index
    %c0_15 = arith.constant 0 : index
    %36 = vector.load %arg4[%c0_14, %c0_15] : memref<128x128xf32, #tpu.memory_space<vmem>>, vector<128x128xf32>
    tpu.vector_store %arg4[%c0_14, %c0_15], %35 {strides = array<i32>} : memref<128x128xf32, #tpu.memory_space<vmem>>, vector<128x128xf32>,
    return
  }
  func.func @transform_0(%arg0: i32) -> (i32, i32) {
    %c0_i32 = arith.constant 0 : i32
    %c0_i32_0 = arith.constant 0 : i32
    return %arg0, %c0_i32 : i32, i32
  }
  func.func @transform_1(%arg0: i32) -> (i32, i32) {
    %c0_i32 = arith.constant 0 : i32
    %c0_i32_0 = arith.constant 0 : i32
    return %arg0, %c0_i32 : i32, i32
  }
  func.func @transform_2(%arg0: i32) -> (i32, i32) {
    %c0_i32 = arith.constant 0 : i32
    %c0_i32_0 = arith.constant 0 : i32
    %c0_i32_1 = arith.constant 0 : i32
    return %c0_i32, %c0_i32_0 : i32, i32
  }
  func.func @transform_3(%arg0: i32) -> (i32, i32) {
    %c0_i32 = arith.constant 0 : i32
    %c0_i32_0 = arith.constant 0 : i32
    return %arg0, %c0_i32 : i32, i32
  }
}

</mosaic_0001>

<bundles_post_ra>
// kernel: controller_v5.1
= control target key start
LH: loop header
LB: loop body
LE: loop exit
PB: predicated region body
PF: predicated region fallthrough
CT: control target
= control target key end

     0   :  { %8 = vsyncpa [#allocation3], 0  ;;  %s1558_s12 = smov 0   ;;  %s1880_s0 = inlined_call_operand.vmem [shape: f32[256,16], index: 0, kind: input, shape index: {}]   ;;  %s1881_s1 = inlined_call_operand.vmem [shape: f32[256,32], index: 1, kind: input, shape index: {}]   ;;  %s1882_s2 = inlined_call_operand.hbm [shape: f32[312,256], index: 2, kind: input, shape index: {}]   ;;  %s1883_s3 = inlined_call_operand.vmem [shape: f32[256,128], index: 3, kind: output, shape index: {}]  }
   0x1 LB: > { %s1241_s13 = sadd.s32 4294967295, %s1532_s12   ;;  %p1243_p0 = scmp.ge.s32.totalorder %s1532_s12, 1  ;;  %s1532_s12 = sphi %s1558_s12, %s14_s12  }
   0x2   : > { %p118_p1 = scmp.lt.s32.totalorder %s1532_s12, 3  ;;  %s1534_s14 = smov [#allocation2]  }
   0x3   : > { %s130_s15 = sshll.u32 %s1534_s14, 4  ;;  %p1570_p3 = scmp.eq.s32.totalorder %s1241_s13, 0  ;;  %s131_s15 = int_to_ptr.vmem [resolvable:$true] %s130_s15 }
   0x4   : > { %p1566_p2 = pnand %p1243_p0, %p118_p1  ;;  %s1507_s18 = scalar_lea.vmem %s131_s15, 9984 }
   0x5   : > { %p1508_p7 = scmp.ne.s32.totalorder %s131_s15, %s1507_s18  ;;  %p1515_p10 = scmp.lt.s32.totalorder %s131_s15, %s131_s15 }
   0x6   : > { %p1478_p4 = pneg %p1566_p2  ;;  %p1516_p11 = scmp.lt.s32.totalorder %s1507_s18, %s1507_s18 }
   0x8   : > { %p1479_p5 = pnand %p1570_p3, %p1478_p4  ;;  %p1517_p12 = por %p1516_p11, %p1515_p10 }
   0xa   : > { %p1498_p6 = pneg %p1479_p5 }
   0xc   : > { %p1510_p8 = pnand %p1508_p7, %p1498_p6 }
   0xe   : > { %p1511_p9 = pneg %p1510_p8 }
  0x10   : > { %p1518_p13 = pnand %p1517_p12, %p1511_p9 }
  0x12   : > { %1521 = shalt.err (!%p1518_p13)
}
  0x13   : > { %s1535_s19 = smov 256   ;;  %s1536_s20 = smov 16  }
  0x14   : > { %1481 = dma.hbm_to_vmem [thread:$0]  (!%p1479_p5), %s1882_s2, 9984, %s131_s15, [#allocation3], %s1535_s19, %s1535_s19, %s1536_s20  }
  0x15   : > { %164 = sbr.rel (%p1566_p2) target bundleno = 699 (0x2bb), region = 32 }
  0x1a   : > { %1527 = dma.done.wait (%p1570_p3), [#allocation3], 9984  }
  0x1b   : > { %1529 = vsyncadd (%p1570_p3), [#allocation3], 4294957312  ;;  %s1248_s23 = sshll.u32 %s1241_s13, 4  ;;  %v250_v0 = vld [vmem:[#allocation2 + $0x50] sm:$0xff]  ;;  %v249_v1 = vld [vmem:[#allocation2 + $0x40] sm:$0xff]  ;;  %vm445_vm0 = vcmask 130048  }
  0x1c   : > { %p194_p0 = scmp.lt.s32.totalorder %s1248_s23, 31  ;;  %v246_v2 = vld [vmem:[#allocation2 + $0x10] sm:$0xff]  ;;  %1358 = vmatprep.subr.mxu0 %v250_v0  ;;  %v245_v3 = vld [vmem:[#allocation2] sm:$0xff]  ;;  %vm251_vm1 = vcmask 261120   ;;  %v742_v18 = vld [vmem:[#allocation2 + $0x158] sm:$0xff] }
  0x1d   : > { %1390 = vmatprep.subr.mxu1 %v246_v2  ;;  %1359 = vmatpush3.msra.mxu0 %v250_v0  ;;  %v248_v4 = vld [vmem:[#allocation2 + $0x30] sm:$0xff]  ;;  %v247_v7 = vld [vmem:[#allocation2 + $0x20] sm:$0xff]  ;;  %v740_v20 = vld [vmem:[#allocation2 + $0x148] sm:$0xff] }
  0x1e   : > { %s1887_s23 = smov (!%p194_p0, %s1248_s23), 31  ;;  %1391 = vmatpush3.msra.mxu1 %v246_v2  ;;  %1360 = vmatprep.subr.mxu0 %v249_v1  ;;  %v741_v19 = vld [vmem:[#allocation2 + $0x150] sm:$0xff]  ;;  %v739_v22 = vld [vmem:[#allocation2 + $0x140] sm:$0xff]  ;;  %v738_v26 = vld [vmem:[#allocation2 + $0x138] sm:$0xff] }
  0x1f   : > { %s1587_s24 = sshll.u32 %s1887_s23, 3  ;;  %1392 = vmatprep.subr.mxu1 %v245_v3  ;;  %1361 = vmatpush3.msra.mxu0 %v249_v1  ;;  %v737_v27 = vld [vmem:[#allocation2 + $0x130] sm:$0xff]  ;;  %v736_v29 = vld [vmem:[#allocation2 + $0x128] sm:$0xff]  ;;  %v735_v33 = vld [vmem:[#allocation2 + $0x120] sm:$0xff] }
  0x20   : > { %s1593_s27 = scalar_lea.vmem %s1880_s0, %s1587_s24  ;;  %s1599_s30 = scalar_lea.vmem %s1881_s1, %s1587_s24  ;;  %1393 = vmatpush3.msra.mxu1 %v245_v3  ;;  %1362 = vmatprep.subr.mxu0 %v248_v4  ;;  %v734_v34 = vld [vmem:[#allocation2 + $0x118] sm:$0xff]  ;;  %v733_v36 = vld [vmem:[#allocation2 + $0x110] sm:$0xff]  ;;  %v732_v40 = vld [vmem:[#allocation2 + $0x108] sm:$0xff] }
  0x21   : > { %v211_v5 = vld [vmem:[%s1593_s27] sm:$0xff]  ;;  %v212_v6 = vld [vmem:[%s1593_s27 + $0x8] sm:$0xff]  ;;  %v213_v9 = vld [vmem:[%s1593_s27 + $0x10] sm:$0xff]  ;;  %1363 = vmatpush3.msra.mxu0 %v248_v4  ;;  %751 = vmatprep.subr.mxu1 %v742_v18  ;;  %s1814_s6 = scalar_lea.vmem %s1883_s3, %s1587_s24 }
  0x22   : > { %v227_v8 = vld [vmem:[%s1599_s30] sm:$0xff]  ;;  %1394 = vmatprep.mubr.msk.f32.mxu1 %vm445_vm0, %v211_v5  ;;  %v228_v10 = vld [vmem:[%s1599_s30 + $0x8] sm:$0xff]  ;;  %1364 = vmatprep.subr.mxu0 %v247_v7  ;;  %v229_v11 = vld [vmem:[%s1599_s30 + $0x10] sm:$0xff] }
  0x23   : > { %1395 = vmatmul.mubr.msk.f32.vlgmr.msra.gmra.mxu1 %vm445_vm0, %v212_v6  ;;  %1366 = vmatprep.mubr.msk.f32.mxu0 %vm251_vm1, %v227_v8  ;;  %v214_v12 = vld [vmem:[%s1593_s27 + $0x18] sm:$0xff]  ;;  %v215_v13 = vld [vmem:[%s1593_s27 + $0x20] sm:$0xff]  ;;  %v216_v16 = vld [vmem:[%s1593_s27 + $0x28] sm:$0xff]  ;;  %v1537_v6 = vmov 0.0  }
  0x24   : > { %1365 = vmatpush3.msra.mxu0 %v247_v7  ;;  %1397 = vmatprep.mubr.msk.f32.mxu1 %vm445_vm0, %v213_v9  ;;  %v230_v14 = vld [vmem:[%s1599_s30 + $0x18] sm:$0xff]  ;;  %v231_v15 = vld [vmem:[%s1599_s30 + $0x20] sm:$0xff]  ;;  %v217_v17 = vld [vmem:[%s1593_s27 + $0x30] sm:$0xff] }
  0x25   : > { %1367 = vmatmul.mubr.msk.f32.vlgmr.msra.gmra.mxu0 %vm251_vm1, %v228_v10  ;;  %v232_v21 = vld [vmem:[%s1599_s30 + $0x28] sm:$0xff]  ;;  %v233_v23 = vld [vmem:[%s1599_s30 + $0x30] sm:$0xff]  ;;  %v218_v24 = vld [vmem:[%s1593_s27 + $0x38] sm:$0xff]  ;;  %752 = vmatpush1.msra.mxu1 %v741_v19 }
  0x26   : > { %1369 = vmatprep.mubr.msk.f32.mxu0 %vm251_vm1, %v229_v11  ;;  %v219_v25 = vld [vmem:[%s1593_s27 + $0x40] sm:$0xff]  ;;  %753 = vmatprep.subr.mxu1 %v740_v20  ;;  %v234_v28 = vld [vmem:[%s1599_s30 + $0x38] sm:$0xff]  ;;  %v220_v31 = vld [vmem:[%s1593_s27 + $0x48] sm:$0xff] }
  0x27   : > { %1398 = vmatmul.mubr.msk.f32.gmra.mxu1 %vm445_vm0, %v214_v12  ;;  %v235_v30 = vld [vmem:[%s1599_s30 + $0x40] sm:$0xff]  ;;  %v221_v32 = vld [vmem:[%s1593_s27 + $0x50] sm:$0xff]  ;;  %v236_v35 = vld [vmem:[%s1599_s30 + $0x48] sm:$0xff] }
  0x28   : > { %1400 = vmatprep.mubr.msk.f32.mxu1 %vm445_vm0, %v215_v13  ;;  %754 = vmatpush1.msra.mxu1 %v739_v22  ;;  %v237_v37 = vld [vmem:[%s1599_s30 + $0x50] sm:$0xff]  ;;  %v222_v38 = vld [vmem:[%s1593_s27 + $0x58] sm:$0xff]  ;;  %v223_v39 = vld [vmem:[%s1593_s27 + $0x60] sm:$0xff] }
  0x29   : > { %1370 = vmatmul.mubr.msk.f32.gmra.mxu0 %vm251_vm1, %v230_v14  ;;  %755 = vmatprep.subr.mxu1 %v738_v26  ;;  %v731_v41 = vld [vmem:[#allocation2 + $0x100] sm:$0xff]  ;;  %v238_v42 = vld [vmem:[%s1599_s30 + $0x58] sm:$0xff]  ;;  %v224_v45 = vld [vmem:[%s1593_s27 + $0x68] sm:$0xff] }
  0x2a   : > { %1372 = vmatprep.mubr.msk.f32.mxu0 %vm251_vm1, %v231_v15  ;;  %756 = vmatpush1.msra.mxu1 %v737_v27  ;;  %v730_v43 = vld [vmem:[#allocation2 + $0xf8] sm:$0xff]  ;;  %v239_v44 = vld [vmem:[%s1599_s30 + $0x60] sm:$0xff]  ;;  %v225_v46 = vld [vmem:[%s1593_s27 + $0x70] sm:$0xff] }
  0x2b   : > { %1401 = vmatmul.mubr.msk.f32.gmra.mxu1 %vm445_vm0, %v216_v16  ;;  %757 = vmatprep.subr.mxu1 %v736_v29  ;;  %v729_v47 = vld [vmem:[#allocation2 + $0xf0] sm:$0xff]  ;;  %v728_v48 = vld [vmem:[#allocation2 + $0xe8] sm:$0xff]  ;;  %v727_v50 = vld [vmem:[#allocation2 + $0xe0] sm:$0xff] }
  0x2c   : > { %1403 = vmatprep.mubr.msk.f32.mxu1 %vm445_vm0, %v217_v17  ;;  %758 = vmatpush1.msra.mxu1 %v735_v33  ;;  %v240_v49 = vld [vmem:[%s1599_s30 + $0x68] sm:$0xff]  ;;  %v241_v51 = vld [vmem:[%s1599_s30 + $0x70] sm:$0xff]  ;;  %v226_v52 = vld [vmem:[%s1593_s27 + $0x78] sm:$0xff]  ;;  %v639_v17 = vlaneseq }
  0x2d   : > { %1373 = vmatmul.mubr.msk.f32.gmra.mxu0 %vm251_vm1, %v232_v21  ;;  %759 = vmatprep.subr.mxu1 %v734_v34  ;;  %v726_v53 = vld [vmem:[#allocation2 + $0xd8] sm:$0xff]  ;;  %v725_v54 = vld [vmem:[#allocation2 + $0xd0] sm:$0xff]  ;;  %v724_v56 = vld [vmem:[#allocation2 + $0xc8] sm:$0xff] }
  0x2e   : > { %1375 = vmatprep.mubr.msk.f32.mxu0 %vm251_vm1, %v233_v23  ;;  %760 = vmatpush1.msra.mxu1 %v733_v36  ;;  %v242_v55 = vld [vmem:[%s1599_s30 + $0x78] sm:$0xff]  ;;  %v723_v57 = vld [vmem:[#allocation2 + $0xc0] sm:$0xff]  ;;  %v721_v59 = vld [vmem:[#allocation2 + $0xb0] sm:$0xff]  ;;  %v1666_v18 = vshrl.u32 %v639_v17, 7 }
  0x2f   : > { %1404 = vmatmul.mubr.msk.f32.gmra.mxu1 %vm445_vm0, %v218_v24  ;;  %761 = vmatprep.subr.mxu1 %v732_v40  ;;  %v722_v58 = vld [vmem:[#allocation2 + $0xb8] sm:$0xff]  ;;  %v720_v60 = vld [vmem:[#allocation2 + $0xa8] sm:$0xff]  ;;  %v719_v61 = vld [vmem:[#allocation2 + $0xa0] sm:$0xff] }
  0x30   : > { %1406 = vmatprep.mubr.msk.f32.mxu1 %vm445_vm0, %v219_v25  ;;  %762 = vmatpush1.msra.mxu1 %v731_v41  ;;  %v718_v62 = vld [vmem:[#allocation2 + $0x98] sm:$0xff]  ;;  %v717_v63 = vld [vmem:[#allocation2 + $0x90] sm:$0xff]  ;;  %v716_v0 = vld [vmem:[#allocation2 + $0x88] sm:$0xff]  ;;  %v641_v20 = vsub.s32 0, %v1666_v18  ;;  %v677_v26 = vsub.s32 1, %v1666_v18 }
  0x31   : > { %1376 = vmatmul.mubr.msk.f32.gmra.mxu0 %vm251_vm1, %v234_v28  ;;  %763 = vmatprep.subr.mxu1 %v730_v43  ;;  %v715_v1 = vld [vmem:[#allocation2 + $0x80] sm:$0xff]  ;;  %v714_v2 = vld [vmem:[#allocation2 + $0x78] sm:$0xff]  ;;  %v713_v3 = vld [vmem:[#allocation2 + $0x70] sm:$0xff] }
  0x32   : > { %1378 = vmatprep.mubr.msk.f32.mxu0 %vm251_vm1, %v235_v30  ;;  %764 = vmatpush1.msra.mxu1 %v729_v47  ;;  %v712_v4 = vld [vmem:[#allocation2 + $0x68] sm:$0xff]  ;;  %v711_v5 = vld [vmem:[#allocation2 + $0x60] sm:$0xff]  ;;  %v979_v7 = vld [vmem:[#allocation2 + $0x250] sm:$0xff] }
  0x33   : > { %1407 = vmatmul.mubr.msk.f32.gmra.mxu1 %vm445_vm0, %v220_v31  ;;  %765 = vmatprep.subr.mxu1 %v728_v48  ;;  %v978_v8 = vld [vmem:[#allocation2 + $0x240] sm:$0xff]  ;;  %v977_v9 = vld [vmem:[#allocation2 + $0x230] sm:$0xff] }
  0x34   : > { %1409 = vmatprep.mubr.msk.f32.mxu1 %vm445_vm0, %v221_v32  ;;  %766 = vmatpush1.msra.mxu1 %v727_v50  ;;  %v976_v10 = vld [vmem:[#allocation2 + $0x220] sm:$0xff]  ;;  %v975_v11 = vld [vmem:[#allocation2 + $0x210] sm:$0xff] }
  0x35   : > { %1379 = vmatmul.mubr.msk.f32.gmra.mxu0 %vm251_vm1, %v236_v35  ;;  %767 = vmatprep.subr.mxu1 %v726_v53  ;;  %v974_v12 = vld [vmem:[#allocation2 + $0x200] sm:$0xff]  ;;  %v973_v13 = vld [vmem:[#allocation2 + $0x1f0] sm:$0xff] }
  0x36   : > { %1381 = vmatprep.mubr.msk.f32.mxu0 %vm251_vm1, %v237_v37  ;;  %768 = vmatpush1.msra.mxu1 %v725_v54  ;;  %v972_v14 = vld [vmem:[#allocation2 + $0x1e0] sm:$0xff]  ;;  %v971_v15 = vld [vmem:[#allocation2 + $0x1d0] sm:$0xff] }
  0x37   : > { %1410 = vmatmul.mubr.msk.f32.gmra.mxu1 %vm445_vm0, %v222_v38  ;;  %769 = vmatprep.subr.mxu1 %v724_v56  ;;  %v970_v16 = vld [vmem:[#allocation2 + $0x1c0] sm:$0xff] }
  0x38   : > { %1412 = vmatprep.mubr.msk.f32.mxu1 %vm445_vm0, %v223_v39  ;;  %770 = vmatpush1.msra.mxu1 %v723_v57  ;;  %v1669_v21 = vld [vmem:[#allocation2 + $0x260] sm:$0xff] }
  0x39   : > { %1382 = vmatmul.mubr.msk.f32.gmra.mxu0 %vm251_vm1, %v238_v42  ;;  %771 = vmatprep.subr.mxu1 %v722_v58  ;;  %v1672_v25 = vrot.slane %v1669_v21, %v641_v20  ;;  %v1678_v34 = vrot.slane %v1669_v21, %v677_v26 }
  0x3a   : > { %1384 = vmatprep.mubr.msk.f32.mxu0 %vm251_vm1, %v239_v44  ;;  %772 = vmatpush1.msra.mxu1 %v721_v59 }
  0x3b   : > { %1413 = vmatmul.mubr.msk.f32.gmra.mxu1 %vm445_vm0, %v224_v45  ;;  %773 = vmatprep.subr.mxu1 %v720_v60 }
  0x3c   : > { %1415 = vmatprep.mubr.msk.f32.mxu1 %vm445_vm0, %v225_v46  ;;  %774 = vmatpush1.msra.mxu1 %v719_v61 }
  0x3d   : > { %1385 = vmatmul.mubr.msk.f32.gmra.mxu0 %vm251_vm1, %v240_v49  ;;  %775 = vmatprep.subr.mxu1 %v718_v62 }
  0x3e   : > { %1387 = vmatprep.mubr.msk.f32.mxu0 %vm251_vm1, %v241_v51  ;;  %776 = vmatpush1.msra.mxu1 %v717_v63 }
  0x3f   : > { %1416 = vmatmul.mubr.msk.f32.gmra.mxu1 %vm445_vm0, %v226_v52  ;;  %777 = vmatprep.subr.mxu1 %v716_v0 }
  0x40   : > { %778 = vmatpush1.msra.mxu1 %v715_v1  ;;  %815 = vmatprep.mubr.f32.mxu1 %v1537_v6 }
  0x41   : > { %1388 = vmatmul.mubr.msk.f32.gmra.mxu0 %vm251_vm1, %v242_v55  ;;  %779 = vmatprep.subr.mxu1 %v714_v2 }
  0x42   : > { %780 = vmatpush1.msra.mxu1 %v713_v3  ;;  %1418 = vmatprep.subr.mxu0 %v979_v7 }
  0x43   : > { %781 = vmatprep.subr.mxu1 %v712_v4  ;;  %1419 = vmatpush3.msra.mxu0 %v979_v7 }
  0x44   : > { %782 = vmatpush1.msra.mxu1 %v711_v5  ;;  %1420 = vmatprep.subr.mxu0 %v978_v8 }
  0x45   : > { %1421 = vmatpush3.msra.mxu0 %v978_v8 }
  0x46   : > { %1422 = vmatprep.subr.mxu0 %v977_v9 }
  0x47   : > { %1423 = vmatpush3.msra.mxu0 %v977_v9 }
  0x48   : > { %1424 = vmatprep.subr.mxu0 %v976_v10 }
  0x49   : > { %1425 = vmatpush3.msra.mxu0 %v976_v10 }
  0x4a   : > { %1426 = vmatprep.subr.mxu0 %v975_v11 }
  0x4b   : > { %1427 = vmatpush3.msra.mxu0 %v975_v11 }
  0x4c   : > { %1428 = vmatprep.subr.mxu0 %v974_v12 }
  0x4d   : > { %1429 = vmatpush3.msra.mxu0 %v974_v12 }
  0x4e   : > { %1430 = vmatprep.subr.mxu0 %v973_v13 }
  0x4f   : > { %1431 = vmatpush3.msra.mxu0 %v973_v13 }
  0x50   : > { %1432 = vmatprep.subr.mxu0 %v972_v14 }
  0x51   : > { %1433 = vmatpush3.msra.mxu0 %v972_v14 }
  0x52   : > { %1434 = vmatprep.subr.mxu0 %v971_v15 }
  0x53   : > { %1435 = vmatpush3.msra.mxu0 %v971_v15 }
  0x54   : > { %1436 = vmatprep.subr.mxu0 %v970_v16 }
  0x55   : > { %1437 = vmatpush3.msra.mxu0 %v970_v16 }
  0xe3   : > { %v1396_v19 = vpop.f32.mrf.mxu1 }
  0xe5   : > { %v560_v22 = vpop.f32.mrf.mxu1  ;;  %v1368_v23 = vpop.f32.mrf.mxu0 }
  0xe6   : > { %v566_v24 = vadd.f32 %v1396_v19, %v1368_v23 }
  0xe7   : > { %v1399_v27 = vpop.f32.mrf.mxu1  ;;  %v366_v28 = vpop.f32.mrf.mxu0 }
  0xe8   : > { %v561_v29 = vadd.f32 %v560_v22, %v366_v28  ;;  %v644_v32 = vadd.f32 %v1672_v25, %v566_v24 }
  0xe9   : > { %v1371_v30 = vpop.f32.mrf.mxu0  ;;  %v570_v31 = vpop.f32.mrf.mxu1 }
  0xea   : > { %v643_v33 = vadd.f32 %v1672_v25, %v561_v29  ;;  %v576_v40 = vadd.f32 %v1399_v27, %v1371_v30  ;;  %v680_v43 = vmul.f32 %v1678_v34, %v644_v32  ;;  %vm660_vm3 = vcmp.gt.f32.partialorder %v644_v32, 0.0 }
  0xeb   : > { %v376_v35 = vpop.f32.mrf.mxu0  ;;  %v1402_v36 = vpop.f32.mrf.mxu1 }
  0xec   : > { %vm659_vm2 = vcmp.gt.f32.partialorder %v643_v33, 0.0  ;;  %v679_v37 = vmul.f32 %v1678_v34, %v643_v33  ;;  %v571_v38 = vadd.f32 %v570_v31, %v376_v35  ;;  %v646_v46 = vadd.f32 %v1672_v25, %v576_v40 }
  0xed   : > { %v1374_v39 = vpop.f32.mrf.mxu0  ;;  %v580_v45 = vpop.f32.mrf.mxu1  ;;  %v696_v48 = vsel %vm660_vm3, %v644_v32, %v680_v43 }
  0xee   : > { %v645_v41 = vadd.f32 %v1672_v25, %v571_v38  ;;  %v695_v42 = vsel %vm659_vm2, %v643_v33, %v679_v37  ;;  %v586_v52 = vadd.f32 %v1402_v36, %v1374_v39  ;;  %v682_v55 = vmul.f32 %v1678_v34, %v646_v46 }
  0xef   : > { %816 = vmatmul.mubr.f32.vlgmr.msra.gmra.mxu1 %v695_v42  ;;  %v386_v44 = vpop.f32.mrf.mxu0  ;;  %v1405_v51 = vpop.f32.mrf.mxu1  ;;  %vm662_vm5 = vcmp.gt.f32.partialorder %v646_v46, 0.0 }
  0xf0   : > { %821 = vmatprep.mubr.f32.mxu1 %v1537_v6  ;;  %v581_v47 = vadd.f32 %v580_v45, %v386_v44  ;;  %v681_v49 = vmul.f32 %v1678_v34, %v645_v41  ;;  %vm661_vm4 = vcmp.gt.f32.partialorder %v645_v41, 0.0  ;;  %v648_v58 = vadd.f32 %v1672_v25, %v586_v52 }
  0xf1   : > { %v1377_v50 = vpop.f32.mrf.mxu0  ;;  %v590_v57 = vpop.f32.mrf.mxu1  ;;  %v698_v60 = vsel %vm662_vm5, %v646_v46, %v682_v55 }
  0xf2   : > { %v647_v53 = vadd.f32 %v1672_v25, %v581_v47  ;;  %v697_v54 = vsel %vm661_vm4, %v645_v41, %v681_v49  ;;  %v596_v0 = vadd.f32 %v1405_v51, %v1377_v50  ;;  %v684_v3 = vmul.f32 %v1678_v34, %v648_v58 }
  0xf3   : > { %822 = vmatmul.mubr.f32.gmra.mxu1 %v696_v48  ;;  %v396_v56 = vpop.f32.mrf.mxu0  ;;  %v1408_v63 = vpop.f32.mrf.mxu1  ;;  %vm664_vm7 = vcmp.gt.f32.partialorder %v648_v58, 0.0 }
  0xf4   : > { %827 = vmatprep.mubr.f32.mxu1 %v1537_v6  ;;  %v591_v59 = vadd.f32 %v590_v57, %v396_v56  ;;  %v683_v61 = vmul.f32 %v1678_v34, %v647_v53  ;;  %vm663_vm6 = vcmp.gt.f32.partialorder %v647_v53, 0.0  ;;  %v650_v7 = vadd.f32 %v1672_v25, %v596_v0  ;;  %v965_v0 = vld [vmem:[#allocation2 + $0x170] sm:$0xff] }
  0xf5   : > { %v1380_v62 = vpop.f32.mrf.mxu0  ;;  %v600_v5 = vpop.f32.mrf.mxu1  ;;  %v700_v9 = vsel %vm664_vm7, %v648_v58, %v684_v3 }
  0xf6   : > { %v649_v1 = vadd.f32 %v1672_v25, %v591_v59  ;;  %v699_v2 = vsel %vm663_vm6, %v647_v53, %v683_v61  ;;  %v606_v13 = vadd.f32 %v1408_v63, %v1380_v62  ;;  %v686_v16 = vmul.f32 %v1678_v34, %v650_v7  ;;  %v969_v61 = vld [vmem:[#allocation2 + $0x1b0] sm:$0xff]  ;;  %v966_v63 = vld [vmem:[#allocation2 + $0x180] sm:$0xff] }
  0xf7   : > { %828 = vmatmul.mubr.f32.gmra.mxu1 %v697_v54  ;;  %v406_v4 = vpop.f32.mrf.mxu0  ;;  %v1411_v12 = vpop.f32.mrf.mxu1  ;;  %vm666_vm9 = vcmp.gt.f32.partialorder %v650_v7, 0.0  ;;  %1438 = vmatprep.subr.mxu0 %v969_v61  ;;  %v967_v62 = vld [vmem:[#allocation2 + $0x190] sm:$0xff] }
  0xf8   : > { %833 = vmatprep.mubr.f32.mxu1 %v1537_v6  ;;  %v601_v8 = vadd.f32 %v600_v5, %v406_v4  ;;  %v685_v10 = vmul.f32 %v1678_v34, %v649_v1  ;;  %vm665_vm8 = vcmp.gt.f32.partialorder %v649_v1, 0.0  ;;  %v652_v20 = vadd.f32 %v1672_v25, %v606_v13  ;;  %1439 = vmatpush3.msra.mxu0 %v969_v61 }
  0xf9   : > { %v1383_v11 = vpop.f32.mrf.mxu0  ;;  %v610_v19 = vpop.f32.mrf.mxu1  ;;  %v702_v23 = vsel %vm666_vm9, %v650_v7, %v686_v16 }
  0xfa   : > { %v651_v14 = vadd.f32 %v1672_v25, %v601_v8  ;;  %v701_v15 = vsel %vm665_vm8, %v649_v1, %v685_v10  ;;  %v616_v28 = vadd.f32 %v1411_v12, %v1383_v11  ;;  %v688_v31 = vmul.f32 %v1678_v34, %v652_v20 }
  0xfb   : > { %834 = vmatmul.mubr.f32.gmra.mxu1 %v698_v60  ;;  %v416_v17 = vpop.f32.mrf.mxu0  ;;  %v1414_v27 = vpop.f32.mrf.mxu1  ;;  %vm668_vm11 = vcmp.gt.f32.partialorder %v652_v20, 0.0  ;;  %v745_v1 = vsub.s32 2, %v1666_v18 }
  0xfc   : > { %839 = vmatprep.mubr.f32.mxu1 %v1537_v6  ;;  %v611_v22 = vadd.f32 %v610_v19, %v416_v17  ;;  %v687_v24 = vmul.f32 %v1678_v34, %v651_v14  ;;  %vm667_vm10 = vcmp.gt.f32.partialorder %v651_v14, 0.0  ;;  %v654_v35 = vadd.f32 %v1672_v25, %v616_v28 }
  0xfd   : > { %v1386_v26 = vpop.f32.mrf.mxu0  ;;  %v620_v33 = vpop.f32.mrf.mxu1  ;;  %v704_v37 = vsel %vm668_vm11, %v652_v20, %v688_v31 }
  0xfe   : > { %v653_v29 = vadd.f32 %v1672_v25, %v611_v22  ;;  %v703_v30 = vsel %vm667_vm10, %v651_v14, %v687_v24  ;;  %v626_v41 = vadd.f32 %v1414_v27, %v1386_v26  ;;  %v690_v44 = vmul.f32 %v1678_v34, %v654_v35 }
  0xff   : > { %840 = vmatmul.mubr.f32.gmra.mxu1 %v699_v2  ;;  %v426_v32 = vpop.f32.mrf.mxu0  ;;  %v1417_v40 = vpop.f32.mrf.mxu1  ;;  %vm670_vm13 = vcmp.gt.f32.partialorder %v654_v35, 0.0  ;;  %v930_v2 = vsub.s32 3, %v1666_v18 }
 0x100   : > { %845 = vmatprep.mubr.f32.mxu1 %v1537_v6  ;;  %v621_v36 = vadd.f32 %v620_v33, %v426_v32  ;;  %v689_v38 = vmul.f32 %v1678_v34, %v653_v29  ;;  %vm669_vm12 = vcmp.gt.f32.partialorder %v653_v29, 0.0  ;;  %v656_v47 = vadd.f32 %v1672_v25, %v626_v41 }
 0x101   : > { %v1389_v39 = vpop.f32.mrf.mxu0  ;;  %v630_v46 = vpop.f32.mrf.mxu1  ;;  %v706_v49 = vsel %vm670_vm13, %v654_v35, %v690_v44  ;;  %v1734_v5 = vrot.slane %v1669_v21, %v930_v2 }
 0x102   : > { %v655_v42 = vadd.f32 %v1672_v25, %v621_v36  ;;  %v705_v43 = vsel %vm669_vm12, %v653_v29, %v689_v38  ;;  %v636_v51 = vadd.f32 %v1417_v40, %v1389_v39  ;;  %v692_v54 = vmul.f32 %v1678_v34, %v656_v47 }
 0x103   : > { %846 = vmatmul.mubr.f32.gmra.mxu1 %v700_v9  ;;  %v436_v45 = vpop.f32.mrf.mxu0  ;;  %vm672_vm15 = vcmp.gt.f32.partialorder %v656_v47, 0.0 }
 0x104   : > { %851 = vmatprep.mubr.f32.mxu1 %v1537_v6  ;;  %v631_v48 = vadd.f32 %v630_v46, %v436_v45  ;;  %v691_v50 = vmul.f32 %v1678_v34, %v655_v42  ;;  %vm671_vm14 = vcmp.gt.f32.partialorder %v655_v42, 0.0  ;;  %v658_v55 = vadd.f32 %v1672_v25, %v636_v51 }
 0x105   : > { %v708_v56 = vsel %vm672_vm15, %v656_v47, %v692_v54 }
 0x106   : > { %v657_v52 = vadd.f32 %v1672_v25, %v631_v48  ;;  %v707_v53 = vsel %vm671_vm14, %v655_v42, %v691_v50  ;;  %v694_v59 = vmul.f32 %v1678_v34, %v658_v55  ;;  %vm674_vm1 = vcmp.gt.f32.partialorder %v658_v55, 0.0  ;;  %v968_v25 = vld [vmem:[#allocation2 + $0x1a0] sm:$0xff] }
 0x107   : > { %852 = vmatmul.mubr.f32.gmra.mxu1 %v701_v15  ;;  %1440 = vmatprep.subr.mxu0 %v968_v25 }
 0x108   : > { %857 = vmatprep.mubr.f32.mxu1 %v1537_v6  ;;  %v693_v57 = vmul.f32 %v1678_v34, %v657_v52  ;;  %vm673_vm0 = vcmp.gt.f32.partialorder %v657_v52, 0.0  ;;  %v710_v60 = vsel %vm674_vm1, %v658_v55, %v694_v59  ;;  %1441 = vmatpush3.msra.mxu0 %v968_v25  ;;  %v964_v34 = vld [vmem:[#allocation2 + $0x160] sm:$0xff] }
 0x109   : > { %1442 = vmatprep.subr.mxu0 %v967_v62 }
 0x10a   : > { %v709_v58 = vsel %vm673_vm0, %v657_v52, %v693_v57  ;;  %1443 = vmatpush3.msra.mxu0 %v967_v62 }
 0x10b   : > { %858 = vmatmul.mubr.f32.gmra.mxu1 %v702_v23  ;;  %1444 = vmatprep.subr.mxu0 %v966_v63 }
 0x10c   : > { %863 = vmatprep.mubr.f32.mxu1 %v1537_v6  ;;  %1445 = vmatpush3.msra.mxu0 %v966_v63 }
 0x10d   : > { %1446 = vmatprep.subr.mxu0 %v965_v0 }
 0x10e   : > { %1447 = vmatpush3.msra.mxu0 %v965_v0 }
 0x10f   : > { %864 = vmatmul.mubr.f32.gmra.mxu1 %v703_v30  ;;  %1448 = vmatprep.subr.mxu0 %v964_v34 }
 0x110   : > { %869 = vmatprep.mubr.f32.mxu1 %v1537_v6  ;;  %1449 = vmatpush3.msra.mxu0 %v964_v34 }
 0x113   : > { %870 = vmatmul.mubr.f32.gmra.mxu1 %v704_v37 }
 0x114   : > { %875 = vmatprep.mubr.f32.mxu1 %v1537_v6 }
 0x117   : > { %876 = vmatmul.mubr.f32.gmra.mxu1 %v705_v43 }
 0x118   : > { %881 = vmatprep.mubr.f32.mxu1 %v1537_v6 }
 0x11b   : > { %882 = vmatmul.mubr.f32.gmra.mxu1 %v706_v49 }
 0x11c   : > { %887 = vmatprep.mubr.f32.mxu1 %v1537_v6 }
 0x11f   : > { %888 = vmatmul.mubr.f32.gmra.mxu1 %v707_v53 }
 0x120   : > { %893 = vmatprep.mubr.f32.mxu1 %v1537_v6 }
 0x123   : > { %894 = vmatmul.mubr.f32.gmra.mxu1 %v708_v56 }
 0x124   : > { %899 = vmatprep.mubr.f32.mxu1 %v1537_v6 }
 0x127   : > { %900 = vmatmul.mubr.f32.gmra.mxu1 %v709_v58 }
 0x128   : > { %905 = vmatprep.mubr.f32.mxu1 %v1537_v6  ;;  %v244_v6 = vld [vmem:[#allocation2 + $0x268] sm:$0xff] }
 0x129   : > { %v1729_v3 = vrot.slane %v244_v6, %v745_v1 }
 0x12b   : > { %906 = vmatmul.mubr.f32.gmra.mxu1 %v710_v60 }
 0x1af   : > { %v1731_v4 = vpop.f32.mrf.mxu1 }
 0x1b1   : > { %v819_v7 = vpop.f32.mrf.mxu1 }
 0x1b2   : > { %v820_v8 = vadd.f32 %v819_v7, %v1729_v3 }
 0x1b3   : > { %v1737_v9 = vpop.f32.mrf.mxu1 }
 0x1b4   : > { %v932_v10 = vmul.f32 %v1734_v5, %v820_v8  ;;  %vm912_vm2 = vcmp.gt.f32.partialorder %v820_v8, 0.0 }
 0x1b5   : > { %v825_v11 = vpop.f32.mrf.mxu1 }
 0x1b6   : > { %v826_v12 = vadd.f32 %v825_v11, %v1729_v3  ;;  %v948_v13 = vsel %vm912_vm2, %v820_v8, %v932_v10 }
 0x1b7   : > { %v1741_v14 = vpop.f32.mrf.mxu1  ;;  %1450 = vmatprep.mubr.f32.mxu0 %v948_v13 }
 0x1b8   : > { %vm913_vm3 = vcmp.gt.f32.partialorder %v826_v12, 0.0  ;;  %v933_v15 = vmul.f32 %v1734_v5, %v826_v12 }
 0x1b9   : > { %v831_v16 = vpop.f32.mrf.mxu1 }
 0x1ba   : > { %v949_v17 = vsel %vm913_vm3, %v826_v12, %v933_v15  ;;  %v832_v19 = vadd.f32 %v831_v16, %v1729_v3 }
 0x1bb   : > { %v1745_v20 = vpop.f32.mrf.mxu1  ;;  %1451 = vmatmul.mubr.f32.vlgmr.msra.gmra.mxu0 %v949_v17 }
 0x1bc   : > { %v934_v22 = vmul.f32 %v1734_v5, %v832_v19  ;;  %vm914_vm4 = vcmp.gt.f32.partialorder %v832_v19, 0.0 }
 0x1bd   : > { %v837_v23 = vpop.f32.mrf.mxu1 }
 0x1be   : > { %v838_v24 = vadd.f32 %v837_v23, %v1729_v3  ;;  %v950_v26 = vsel %vm914_vm4, %v832_v19, %v934_v22 }
 0x1bf   : > { %v1749_v27 = vpop.f32.mrf.mxu1  ;;  %1453 = vmatprep.mubr.f32.mxu0 %v950_v26 }
 0x1c0   : > { %v935_v28 = vmul.f32 %v1734_v5, %v838_v24  ;;  %vm915_vm5 = vcmp.gt.f32.partialorder %v838_v24, 0.0 }
 0x1c1   : > { %v843_v29 = vpop.f32.mrf.mxu1 }
 0x1c2   : > { %v844_v30 = vadd.f32 %v843_v29, %v1729_v3  ;;  %v951_v31 = vsel %vm915_vm5, %v838_v24, %v935_v28 }
 0x1c3   : > { %v1753_v32 = vpop.f32.mrf.mxu1  ;;  %1454 = vmatmul.mubr.f32.gmra.mxu0 %v951_v31 }
 0x1c4   : > { %v936_v33 = vmul.f32 %v1734_v5, %v844_v30  ;;  %vm916_vm6 = vcmp.gt.f32.partialorder %v844_v30, 0.0 }
 0x1c5   : > { %v849_v35 = vpop.f32.mrf.mxu1 }
 0x1c6   : > { %v850_v36 = vadd.f32 %v849_v35, %v1729_v3  ;;  %v952_v37 = vsel %vm916_vm6, %v844_v30, %v936_v33 }
 0x1c7   : > { %v1757_v38 = vpop.f32.mrf.mxu1  ;;  %1456 = vmatprep.mubr.f32.mxu0 %v952_v37  ;;  %v982_v37 = vsub.s32 4, %v1666_v18 }
 0x1c8   : > { %v937_v39 = vmul.f32 %v1734_v5, %v850_v36  ;;  %vm917_vm7 = vcmp.gt.f32.partialorder %v850_v36, 0.0 }
 0x1c9   : > { %v855_v40 = vpop.f32.mrf.mxu1 }
 0x1ca   : > { %v856_v41 = vadd.f32 %v855_v40, %v1729_v3  ;;  %v953_v42 = vsel %vm917_vm7, %v850_v36, %v937_v39  ;;  %v1800_v39 = vrot.slane %v1669_v21, %v982_v37  ;;  %v1805_v40 = vrot.slane %v1669_v21, %v745_v1 }
 0x1cb   : > { %v1761_v43 = vpop.f32.mrf.mxu1  ;;  %1457 = vmatmul.mubr.f32.gmra.mxu0 %v953_v42 }
 0x1cc   : > { %v938_v44 = vmul.f32 %v1734_v5, %v856_v41  ;;  %vm918_vm8 = vcmp.gt.f32.partialorder %v856_v41, 0.0  ;;  %v818_v18 = vadd.f32 %v1731_v4, %v1805_v40 }
 0x1cd   : > { %v861_v45 = vpop.f32.mrf.mxu1 }
 0x1ce   : > { %v862_v46 = vadd.f32 %v861_v45, %v1729_v3  ;;  %v954_v47 = vsel %vm918_vm8, %v856_v41, %v938_v44  ;;  %v836_v45 = vadd.f32 %v1745_v20, %v1805_v40 }
 0x1cf   : > { %v1765_v48 = vpop.f32.mrf.mxu1  ;;  %1459 = vmatprep.mubr.f32.mxu0 %v954_v47 }
 0x1d0   : > { %v939_v49 = vmul.f32 %v1734_v5, %v862_v46  ;;  %vm919_vm9 = vcmp.gt.f32.partialorder %v862_v46, 0.0 }
 0x1d1   : > { %v867_v50 = vpop.f32.mrf.mxu1 }
 0x1d2   : > { %v868_v51 = vadd.f32 %v867_v50, %v1729_v3  ;;  %v955_v52 = vsel %vm919_vm9, %v862_v46, %v939_v49  ;;  %v830_v49 = vadd.f32 %v1741_v14, %v1805_v40 }
 0x1d3   : > { %v1769_v53 = vpop.f32.mrf.mxu1  ;;  %1460 = vmatmul.mubr.f32.gmra.mxu0 %v955_v52 }
 0x1d4   : > { %v940_v54 = vmul.f32 %v1734_v5, %v868_v51  ;;  %vm920_vm10 = vcmp.gt.f32.partialorder %v868_v51, 0.0 }
 0x1d5   : > { %v873_v55 = vpop.f32.mrf.mxu1 }
 0x1d6   : > { %v874_v56 = vadd.f32 %v873_v55, %v1729_v3  ;;  %v956_v57 = vsel %vm920_vm10, %v868_v51, %v940_v54  ;;  %v848_v54 = vadd.f32 %v1753_v32, %v1805_v40 }
 0x1d7   : > { %v1773_v58 = vpop.f32.mrf.mxu1  ;;  %1462 = vmatprep.mubr.f32.mxu0 %v956_v57 }
 0x1d8   : > { %v941_v59 = vmul.f32 %v1734_v5, %v874_v56  ;;  %vm921_vm11 = vcmp.gt.f32.partialorder %v874_v56, 0.0 }
 0x1d9   : > { %v879_v60 = vpop.f32.mrf.mxu1 }
 0x1da   : > { %v880_v61 = vadd.f32 %v879_v60, %v1729_v3  ;;  %v957_v25 = vsel %vm921_vm11, %v874_v56, %v941_v59  ;;  %v842_v56 = vadd.f32 %v1749_v27, %v1805_v40 }
 0x1db   : > { %v1777_v62 = vpop.f32.mrf.mxu1  ;;  %1463 = vmatmul.mubr.f32.gmra.mxu0 %v957_v25 }
 0x1dc   : > { %v942_v63 = vmul.f32 %v1734_v5, %v880_v61  ;;  %vm922_vm12 = vcmp.gt.f32.partialorder %v880_v61, 0.0 }
 0x1dd   : > { %v885_v0 = vpop.f32.mrf.mxu1 }
 0x1de   : > { %v886_v34 = vadd.f32 %v885_v0, %v1729_v3  ;;  %v958_v6 = vsel %vm922_vm12, %v880_v61, %v942_v63  ;;  %v860_v61 = vadd.f32 %v1761_v43, %v1805_v40  ;;  %v854_v63 = vadd.f32 %v1757_v38, %v1805_v40 }
 0x1df   : > { %v1781_v2 = vpop.f32.mrf.mxu1  ;;  %1465 = vmatprep.mubr.f32.mxu0 %v958_v6 }
 0x1e0   : > { %v943_v7 = vmul.f32 %v1734_v5, %v886_v34  ;;  %vm923_vm13 = vcmp.gt.f32.partialorder %v886_v34, 0.0 }
 0x1e1   : > { %v891_v8 = vpop.f32.mrf.mxu1 }
 0x1e2   : > { %v892_v10 = vadd.f32 %v891_v8, %v1729_v3  ;;  %v959_v11 = vsel %vm923_vm13, %v886_v34, %v943_v7  ;;  %v872_v7 = vadd.f32 %v1769_v53, %v1805_v40 }
 0x1e3   : > { %v1785_v12 = vpop.f32.mrf.mxu1  ;;  %1466 = vmatmul.mubr.f32.gmra.mxu0 %v959_v11 }
 0x1e4   : > { %v944_v13 = vmul.f32 %v1734_v5, %v892_v10  ;;  %vm924_vm14 = vcmp.gt.f32.partialorder %v892_v10, 0.0 }
 0x1e5   : > { %v897_v15 = vpop.f32.mrf.mxu1 }
 0x1e6   : > { %v898_v16 = vadd.f32 %v897_v15, %v1729_v3  ;;  %v960_v17 = vsel %vm924_vm14, %v892_v10, %v944_v13  ;;  %v866_v10 = vadd.f32 %v1765_v48, %v1805_v40 }
 0x1e7   : > { %v1789_v19 = vpop.f32.mrf.mxu1  ;;  %1468 = vmatprep.mubr.f32.mxu0 %v960_v17 }
 0x1e8   : > { %v945_v22 = vmul.f32 %v1734_v5, %v898_v16  ;;  %vm925_vm15 = vcmp.gt.f32.partialorder %v898_v16, 0.0 }
 0x1e9   : > { %v903_v23 = vpop.f32.mrf.mxu1 }
 0x1ea   : > { %v904_v24 = vadd.f32 %v903_v23, %v1729_v3  ;;  %v961_v26 = vsel %vm925_vm15, %v898_v16, %v945_v22  ;;  %v884_v16 = vadd.f32 %v1777_v62, %v1805_v40  ;;  %v878_v22 = vadd.f32 %v1773_v58, %v1805_v40 }
 0x1eb   : > { %v1793_v28 = vpop.f32.mrf.mxu1  ;;  %1469 = vmatmul.mubr.f32.gmra.mxu0 %v961_v26 }
 0x1ec   : > { %v946_v29 = vmul.f32 %v1734_v5, %v904_v24  ;;  %vm926_vm0 = vcmp.gt.f32.partialorder %v904_v24, 0.0  ;;  %v908_v37 = vadd.f32 %v1793_v28, %v1805_v40 }
 0x1ed   : > { %v909_v30 = vpop.f32.mrf.mxu1 }
 0x1ee   : > { %v910_v31 = vadd.f32 %v909_v30, %v1729_v3  ;;  %v962_v33 = vsel %vm926_vm0, %v904_v24, %v946_v29  ;;  %v824_v3 = vadd.f32 %v1737_v9, %v1805_v40  ;;  %v896_v29 = vadd.f32 %v1785_v12, %v1805_v40 }
 0x1ef   : > { %1471 = vmatprep.mubr.f32.mxu0 %v962_v33 }
 0x1f0   : > { %v947_v35 = vmul.f32 %v1734_v5, %v910_v31  ;;  %vm927_vm1 = vcmp.gt.f32.partialorder %v910_v31, 0.0 }
 0x1f2   : > { %v963_v36 = vsel %vm927_vm1, %v910_v31, %v947_v35  ;;  %v890_v31 = vadd.f32 %v1781_v2, %v1805_v40 }
 0x1f3   : > { %1472 = vmatmul.mubr.f32.gmra.mxu0 %v963_v36 }
 0x27b   : > { %v1452_v41 = vpop.f32.mrf.mxu0 }
 0x27c   : > { %v1056_v42 = vadd.f32 %v1452_v41, %v1800_v39 }
 0x27d   : > { %v1050_v5 = vpop.f32.mrf.mxu0 }
 0x27e   : > { %v1130_v21 = vadd.f32 %v1056_v42, %v824_v3  ;;  %v1051_v1 = vadd.f32 %v1050_v5, %v1800_v39  ;;  %v902_v3 = vadd.f32 %v1789_v19, %v1805_v40 }
 0x280   : > { %1146 = vst [vmem:[%s1814_s6 + $0x8] sm:$0xff] %v1130_v21  ;;  %v1129_v9 = vadd.f32 %v1051_v1, %v818_v18 }
 0x282   : > { %1145 = vst [vmem:[%s1814_s6] sm:$0xff] %v1129_v9 }
 0x283   : > { %v1455_v44 = vpop.f32.mrf.mxu0 }
 0x284   : > { %v1066_v46 = vadd.f32 %v1455_v44, %v1800_v39 }
 0x285   : > { %v1060_v47 = vpop.f32.mrf.mxu0 }
 0x286   : > { %v1132_v50 = vadd.f32 %v1066_v46, %v836_v45  ;;  %v1061_v4 = vadd.f32 %v1060_v47, %v1800_v39 }
 0x288   : > { %1148 = vst [vmem:[%s1814_s6 + $0x18] sm:$0xff] %v1132_v50  ;;  %v1131_v51 = vadd.f32 %v1061_v4, %v830_v49 }
 0x28a   : > { %1147 = vst [vmem:[%s1814_s6 + $0x10] sm:$0xff] %v1131_v51 }
 0x28b   : > { %v1458_v52 = vpop.f32.mrf.mxu0 }
 0x28c   : > { %v1076_v20 = vadd.f32 %v1458_v52, %v1800_v39 }
 0x28d   : > { %v1070_v55 = vpop.f32.mrf.mxu0 }
 0x28e   : > { %v1134_v57 = vadd.f32 %v1076_v20, %v848_v54  ;;  %v1071_v14 = vadd.f32 %v1070_v55, %v1800_v39 }
 0x290   : > { %1150 = vst [vmem:[%s1814_s6 + $0x28] sm:$0xff] %v1134_v57  ;;  %v1133_v59 = vadd.f32 %v1071_v14, %v842_v56 }
 0x292   : > { %1149 = vst [vmem:[%s1814_s6 + $0x20] sm:$0xff] %v1133_v59 }
 0x293   : > { %v1461_v60 = vpop.f32.mrf.mxu0 }
 0x294   : > { %v1086_v32 = vadd.f32 %v1461_v60, %v1800_v39 }
 0x295   : > { %v1080_v25 = vpop.f32.mrf.mxu0 }
 0x296   : > { %v1136_v0 = vadd.f32 %v1086_v32, %v860_v61  ;;  %v1081_v27 = vadd.f32 %v1080_v25, %v1800_v39 }
 0x298   : > { %1152 = vst [vmem:[%s1814_s6 + $0x38] sm:$0xff] %v1136_v0  ;;  %v1135_v34 = vadd.f32 %v1081_v27, %v854_v63 }
 0x29a   : > { %1151 = vst [vmem:[%s1814_s6 + $0x30] sm:$0xff] %v1135_v34 }
 0x29b   : > { %v1464_v6 = vpop.f32.mrf.mxu0 }
 0x29c   : > { %v1096_v43 = vadd.f32 %v1464_v6, %v1800_v39 }
 0x29d   : > { %v1090_v8 = vpop.f32.mrf.mxu0 }
 0x29e   : > { %v1138_v11 = vadd.f32 %v1096_v43, %v872_v7  ;;  %v1091_v38 = vadd.f32 %v1090_v8, %v1800_v39 }
 0x2a0   : > { %1154 = vst [vmem:[%s1814_s6 + $0x48] sm:$0xff] %v1138_v11  ;;  %v1137_v13 = vadd.f32 %v1091_v38, %v866_v10 }
 0x2a2   : > { %1153 = vst [vmem:[%s1814_s6 + $0x40] sm:$0xff] %v1137_v13 }
 0x2a3   : > { %v1467_v15 = vpop.f32.mrf.mxu0 }
 0x2a4   : > { %v1106_v53 = vadd.f32 %v1467_v15, %v1800_v39 }
 0x2a5   : > { %v1100_v17 = vpop.f32.mrf.mxu0 }
 0x2a6   : > { %v1140_v23 = vadd.f32 %v1106_v53, %v884_v16  ;;  %v1101_v48 = vadd.f32 %v1100_v17, %v1800_v39 }
 0x2a8   : > { %1156 = vst [vmem:[%s1814_s6 + $0x58] sm:$0xff] %v1140_v23  ;;  %v1139_v24 = vadd.f32 %v1101_v48, %v878_v22 }
 0x2aa   : > { %1155 = vst [vmem:[%s1814_s6 + $0x50] sm:$0xff] %v1139_v24 }
 0x2ab   : > { %v1470_v26 = vpop.f32.mrf.mxu0 }
 0x2ac   : > { %v1116_v62 = vadd.f32 %v1470_v26, %v1800_v39 }
 0x2ad   : > { %v1110_v30 = vpop.f32.mrf.mxu0 }
 0x2ae   : > { %v1142_v33 = vadd.f32 %v1116_v62, %v896_v29  ;;  %v1111_v58 = vadd.f32 %v1110_v30, %v1800_v39 }
 0x2b0   : > { %1158 = vst [vmem:[%s1814_s6 + $0x68] sm:$0xff] %v1142_v33  ;;  %v1141_v35 = vadd.f32 %v1111_v58, %v890_v31 }
 0x2b2   : > { %1157 = vst [vmem:[%s1814_s6 + $0x60] sm:$0xff] %v1141_v35 }
 0x2b3   : > { %v1473_v36 = vpop.f32.mrf.mxu0 }
 0x2b4   : > { %v1126_v12 = vadd.f32 %v1473_v36, %v1800_v39 }
 0x2b5   : > { %v1120_v41 = vpop.f32.mrf.mxu0 }
 0x2b6   : > { %v1144_v42 = vadd.f32 %v1126_v12, %v908_v37  ;;  %v1121_v5 = vadd.f32 %v1120_v41, %v1800_v39 }
 0x2b8   : > { %1160 = vst [vmem:[%s1814_s6 + $0x78] sm:$0xff] %v1144_v42  ;;  %v1143_v2 = vadd.f32 %v1121_v5, %v902_v3 }
 0x2ba   : > { %1159 = vst [vmem:[%s1814_s6 + $0x70] sm:$0xff] %v1143_v2 }
 0x2bb PF: > { %s14_s12 = sadd.s32 1, %s1532_s12  }
 0x2bc   : > { %p11_p1 = scmp.ge.s32.totalorder %s14_s12, 4  }
 0x2be   :  { %13 = sbr.rel (!%p11_p1) target bundleno = 1 (0x1), region = 70 }
 0x2c3   :  { %1183 = vsyncpa [#allocation3], 1 }
 0x2c4   :  { %1185 = vsyncpa [#allocation3 + $0x1], 1 }

</bundles_post_ra>
